<compile_context>
chip_gen: v5e
topology: v5e:2x2
jax: 0.10.0
libtpu: 0.0.40
codegen_flags: <defaults>
</compile_context>

<pallas_src>
import functools

import jax
import jax.numpy as jnp
from jax.experimental import pallas as pl
from jax.experimental.pallas import tpu as pltpu


def _round_up(x, m):
    return ((x + m - 1) // m) * m


# ---------------------------------------------------------------------------
# Kernels
# ---------------------------------------------------------------------------
def _mean_agg_kernel(adj_ref, x_ref, inv_ref, out_ref, acc_ref):
    """One (TM, TD) output tile; accumulate adjacency @ features over K tiles,
    scale by precomputed inverse degree in the epilogue."""
    k = pl.program_id(2)

    @pl.when(k == 0)
    def _():
        acc_ref[...] = jnp.zeros_like(acc_ref)

    acc_ref[...] += jnp.dot(adj_ref[...], x_ref[...],
                            preferred_element_type=jnp.float32)

    @pl.when(k == pl.num_programs(2) - 1)
    def _():
        out_ref[...] = (acc_ref[...] * inv_ref[...]).astype(out_ref.dtype)


def _mean_agg_acc_kernel(adj_ref, x_ref, inv_ref, base_ref, out_ref, acc_ref):
    """Same as _mean_agg_kernel, but adds an existing base tile in the epilogue
    (fused cross-edge-type 'sum'; output buffer aliased with `base`)."""
    k = pl.program_id(2)

    @pl.when(k == 0)
    def _():
        acc_ref[...] = jnp.zeros_like(acc_ref)

    acc_ref[...] += jnp.dot(adj_ref[...], x_ref[...],
                            preferred_element_type=jnp.float32)

    @pl.when(k == pl.num_programs(2) - 1)
    def _():
        out_ref[...] = (base_ref[...]
                        + acc_ref[...] * inv_ref[...]).astype(out_ref.dtype)


# ---------------------------------------------------------------------------
# Wrapper around pallas_call
# ---------------------------------------------------------------------------
def _mean_aggregate_padded(adj, x, base=None, *, tm_max=256, tk_max=512):
    """out[v] = (1/deg_v) * sum_u A[v,u] * x[u]   (0 for zero-in-degree rows),
    optionally added to `base` (cross-edge-type sum, aliased output buffer).

    Returns a PADDED (n_dst_pad, d_pad) float32 array; caller slices.
    """
    n_dst, n_src = adj.shape
    d = x.shape[1]

    # Tile sizes: lane-dense hidden tiles, (TM, TK) sized well under the VMEM
    # budget of every generation (v7x 64 MiB, v5e/v6e 128 MiB) even with
    # double-buffering: bf16 (256, 512) adjacency tile = 256 KiB.
    tm = min(tm_max, _round_up(n_dst, 8))
    tk = min(tk_max, _round_up(n_src, 128))
    d_pad = _round_up(d, 128)
    td = d_pad if d_pad <= 512 else 128

    n_dst_pad = _round_up(n_dst, tm)
    n_src_pad = _round_up(n_src, tk)

    # Exact inverse degree, computed once outside the kernel and applied with a
    # single epilogue multiply (no per-K-tile normalization bug, no in-kernel
    # cross-lane reduce / divide).
    deg = jnp.sum(adj.astype(jnp.float32), axis=-1, keepdims=True)
    inv_deg = jnp.where(deg > 0.0, 1.0 / jnp.maximum(deg, 1.0), 0.0)

    # bf16 operands for the MXU (adjacency is exactly 0/1 -> lossless).
    adj_p = jnp.pad(adj.astype(jnp.bfloat16),
                    ((0, n_dst_pad - n_dst), (0, n_src_pad - n_src)))
    x_p = jnp.pad(x.astype(jnp.bfloat16),
                  ((0, n_src_pad - x.shape[0]), (0, d_pad - d)))
    inv_p = jnp.pad(inv_deg, ((0, n_dst_pad - n_dst), (0, 0)))

    grid = (n_dst_pad // tm, d_pad // td, n_src_pad // tk)

    in_specs = [
        pl.BlockSpec((tm, tk), lambda i, j, k: (i, k)),   # adjacency tile
        pl.BlockSpec((tk, td), lambda i, j, k: (k, j)),   # feature tile
        pl.BlockSpec((tm, 1), lambda i, j, k: (i, 0)),    # inverse degree
    ]
    operands = [adj_p, x_p, inv_p]

    if base is None:
        kernel = _mean_agg_kernel
        io_alias = {}
    else:
        kernel = _mean_agg_acc_kernel
        in_specs.append(pl.BlockSpec((tm, td), lambda i, j, k: (i, j)))
        operands.append(base)
        io_alias = {3: 0}   # accumulate in place: base HBM buffer == output

    out_bytes = n_dst_pad * d_pad * 4
    cost = pl.CostEstimate(
        flops=2 * n_dst_pad * n_src_pad * d_pad,
        transcendentals=0,
        bytes_accessed=(adj_p.size * 2 + x_p.size * 2 + inv_p.size * 4
                        + out_bytes * (2 if base is not None else 1)),
    )

    return pl.pallas_call(
        kernel,
        out_shape=jax.ShapeDtypeStruct((n_dst_pad, d_pad), jnp.float32),
        grid=grid,
        in_specs=in_specs,
        out_specs=pl.BlockSpec((tm, td), lambda i, j, k: (i, j)),
        scratch_shapes=[pltpu.VMEM((tm, td), jnp.float32)],
        input_output_aliases=io_alias,
        compiler_params=pltpu.CompilerParams(
            dimension_semantics=("parallel", "parallel", "arbitrary")),
        cost_estimate=cost,
    )(*operands)


# ---------------------------------------------------------------------------
# MultiGraphlayer forward (aggr_type='sum')
# ---------------------------------------------------------------------------
# The DGL heterograph itself is represented as a dict of dense (n_dst, n_src)
# adjacency matrices, one per relation; only the relations that feed the two
# returned node types are computed (matching what the module returns).
@functools.partial(jax.jit, static_argnames=("c_type",))
def multi_graph_layer_forward(c_type, adjs, user_emb, store_emb, food_emb):
    d = user_emb.shape[1]
    n_user = user_emb.shape[0]
    if c_type == "food":
        n_food = food_emb.shape[0]
        # user <- food  ('ou'): single relation, dedicated kernel (no zero adj).
        user_h = _mean_aggregate_padded(adjs["ou"], food_emb)[:n_user, :d]
        # food <- user ('uo')  +  food <- store ('so'): second relation is
        # accumulated into the first relation's (padded) output in place.
        food_h = _mean_aggregate_padded(adjs["uo"], user_emb)
        food_h = _mean_aggregate_padded(adjs["so"], store_emb, base=food_h)
        return user_h, food_h[:n_food, :d]
    else:
        n_store = store_emb.shape[0]
        # user <- store ('su')
        user_h = _mean_aggregate_padded(adjs["su"], store_emb)[:n_user, :d]
        # store <- user ('us')  +  store <- food ('os')
        store_h = _mean_aggregate_padded(adjs["us"], user_emb)
        store_h = _mean_aggregate_padded(adjs["os"], food_emb, base=store_h)
        return user_h, store_h[:n_store, :d]


# ---------------------------------------------------------------------------
# Reference + demo
# ---------------------------------------------------------------------------
def _reference_mean_agg(adj, x):
    # Reference with the same bf16 feature quantization the kernel applies.
    xq = x.astype(jnp.bfloat16).astype(jnp.float32)
    a = adj.astype(jnp.float32)
    deg = a.sum(axis=-1, keepdims=True)
    s = a @ xq
    return jnp.where(deg > 0, s / jnp.maximum(deg, 1.0), 0.0)


if __name__ == "__main__":
    key = jax.random.PRNGKey(0)
    k_u, k_s, k_f, k1, k2, k3 = jax.random.split(key, 6)

    n_user, n_store, n_food, hidden = 8, 8, 16, 32

    user_emb = jax.random.normal(k_u, (n_user, hidden), jnp.float32)
    store_emb = jax.random.normal(k_s, (n_store, hidden), jnp.float32)
    food_emb = jax.random.normal(k_f, (n_food, hidden), jnp.float32)

    # Deterministic random bipartite relations, stored as bf16 (0/1 exact).
    adj_uo = (jax.random.uniform(k1, (n_food, n_user)) < 0.4).astype(jnp.bfloat16)
    adj_so = (jax.random.uniform(k2, (n_food, n_store)) < 0.4).astype(jnp.bfloat16)
    adj_us = (jax.random.uniform(k3, (n_store, n_user)) < 0.4).astype(jnp.bfloat16)
    adjs = {
        "uo": adj_uo, "ou": adj_uo.T,            # user <-> food
        "so": adj_so, "os": adj_so.T,            # store <-> food
        "us": adj_us, "su": adj_us.T,            # user <-> store
    }

    # c_type == 'food'
    user_h, food_h = multi_graph_layer_forward(
        "food", adjs, user_emb, store_emb, food_emb)
    jax.block_until_ready((user_h, food_h))

    user_ref = _reference_mean_agg(adjs["ou"], food_emb)
    food_ref = (_reference_mean_agg(adjs["uo"], user_emb)
                + _reference_mean_agg(adjs["so"], store_emb))
    assert jnp.allclose(user_h, user_ref, atol=2e-4, rtol=2e-4)
    assert jnp.allclose(food_h, food_ref, atol=2e-4, rtol=2e-4)

    # c_type == 'store'
    user_h2, store_h = multi_graph_layer_forward(
        "store", adjs, user_emb, store_emb, food_emb)
    jax.block_until_ready((user_h2, store_h))

    user_ref2 = _reference_mean_agg(adjs["su"], store_emb)
    store_ref = (_reference_mean_agg(adjs["us"], user_emb)
                 + _reference_mean_agg(adjs["os"], food_emb))
    assert jnp.allclose(user_h2, user_ref2, atol=2e-4, rtol=2e-4)
    assert jnp.allclose(store_h, store_ref, atol=2e-4, rtol=2e-4)

    print("KERNEL_OK")
</pallas_src>

<mosaic_0001>
module attributes {stable_mosaic.version = 11 : i64} {
  func.func @_mean_agg_acc_kernel(%arg0: i32, %arg1: i32, %arg2: i32, %arg3: memref<16x128xbf16, #tpu.memory_space<vmem>>, %arg4: memref<128x128xbf16, #tpu.memory_space<vmem>>, %arg5: memref<16x1xf32, #tpu.memory_space<vmem>>, %arg6: memref<16x128xf32, #tpu.memory_space<vmem>>, %arg7: memref<16x128xf32, #tpu.memory_space<vmem>>, %arg8: memref<16x128xf32, #tpu.memory_space<vmem>>) attributes {dimension_semantics = [#tpu.dimension_semantics<parallel>, #tpu.dimension_semantics<parallel>, #tpu.dimension_semantics<arbitrary>], iteration_bounds = array<i64: 1, 1, 1>, scalar_prefetch = 0 : i64, scratch_operands = 1 : i64, tpu.core_type = #tpu.core_type<tc>, window_params = [{transform_indices = @transform_0, window_bounds = array<i64: 16, 128>}, {transform_indices = @transform_1, window_bounds = array<i64: 128, 128>}, {transform_indices = @transform_2, window_bounds = array<i64: 16, 1>}, {transform_indices = @transform_3, window_bounds = array<i64: 16, 128>}, {transform_indices = @transform_4, window_bounds = array<i64: 16, 128>}]} {
    %c0_i32 = arith.constant 0 : i32
    %0 = arith.cmpi eq, %arg2, %c0_i32 : i32
    %1 = arith.extui %0 : i1 to i32
    %c0_i32_0 = arith.constant 0 : i32
    %2 = arith.cmpi ne, %1, %c0_i32_0 : i32
    scf.if %2 {
      %cst_10 = arith.constant 0.000000e+00 : f32
      %12 = vector.broadcast %cst_10 : f32 to vector<16x128xf32>
      %c0_11 = arith.constant 0 : index
      %c0_12 = arith.constant 0 : index
      %13 = vector.load %arg8[%c0_11, %c0_12] : memref<16x128xf32, #tpu.memory_space<vmem>>, vector<16x128xf32>
      tpu.vector_store %arg8[%c0_11, %c0_12], %12 {strides = array<i32>} : memref<16x128xf32, #tpu.memory_space<vmem>>, vector<16x128xf32>,
    } else {
    }
    %c0 = arith.constant 0 : index
    %c0_1 = arith.constant 0 : index
    %3 = vector.load %arg8[%c0, %c0_1] : memref<16x128xf32, #tpu.memory_space<vmem>>, vector<16x128xf32>
    %c0_2 = arith.constant 0 : index
    %c0_3 = arith.constant 0 : index
    %4 = vector.load %arg3[%c0_2, %c0_3] : memref<16x128xbf16, #tpu.memory_space<vmem>>, vector<16x128xbf16>
    %c0_4 = arith.constant 0 : index
    %c0_5 = arith.constant 0 : index
    %5 = vector.load %arg4[%c0_4, %c0_5] : memref<128x128xbf16, #tpu.memory_space<vmem>>, vector<128x128xbf16>
    %cst = arith.constant dense<0.000000e+00> : vector<16x128xf32>
    %6 = tpu.matmul %4, %5, %cst {dimension_numbers = #tpu.dot_dimension_numbers<[1], [0], [0], [1], [0, 0, 1, 1], [], []>} : vector<16x128xbf16>, vector<128x128xbf16>, vector<16x128xf32> -> vector<16x128xf32>
    %7 = arith.addf %3, %6 : vector<16x128xf32>
    %c0_6 = arith.constant 0 : index
    %c0_7 = arith.constant 0 : index
    %8 = vector.load %arg8[%c0_6, %c0_7] : memref<16x128xf32, #tpu.memory_space<vmem>>, vector<16x128xf32>
    tpu.vector_store %arg8[%c0_6, %c0_7], %7 {strides = array<i32>} : memref<16x128xf32, #tpu.memory_space<vmem>>, vector<16x128xf32>,
    %c0_i32_8 = arith.constant 0 : i32
    %9 = arith.cmpi eq, %arg2, %c0_i32_8 : i32
    %10 = arith.extui %9 : i1 to i32
    %c0_i32_9 = arith.constant 0 : i32
    %11 = arith.cmpi ne, %10, %c0_i32_9 : i32
    scf.if %11 {
      %c0_10 = arith.constant 0 : index
      %c0_11 = arith.constant 0 : index
      %12 = vector.load %arg6[%c0_10, %c0_11] : memref<16x128xf32, #tpu.memory_space<vmem>>, vector<16x128xf32>
      %c0_12 = arith.constant 0 : index
      %c0_13 = arith.constant 0 : index
      %13 = vector.load %arg8[%c0_12, %c0_13] : memref<16x128xf32, #tpu.memory_space<vmem>>, vector<16x128xf32>
      %c0_14 = arith.constant 0 : index
      %c0_15 = arith.constant 0 : index
      %14 = vector.load %arg5[%c0_14, %c0_15] : memref<16x1xf32, #tpu.memory_space<vmem>>, vector<16x1xf32>
      %15 = vector.broadcast %14 : vector<16x1xf32> to vector<16x128xf32>
      %16 = arith.mulf %13, %15 : vector<16x128xf32>
      %17 = arith.addf %12, %16 : vector<16x128xf32>
      %c0_16 = arith.constant 0 : index
      %c0_17 = arith.constant 0 : index
      %18 = vector.load %arg7[%c0_16, %c0_17] : memref<16x128xf32, #tpu.memory_space<vmem>>, vector<16x128xf32>
      tpu.vector_store %arg7[%c0_16, %c0_17], %17 {strides = array<i32>} : memref<16x128xf32, #tpu.memory_space<vmem>>, vector<16x128xf32>,
    } else {
    }
    return
  }
  func.func @transform_0(%arg0: i32, %arg1: i32, %arg2: i32) -> (i32, i32) {
    %c0_i32 = arith.constant 0 : i32
    return %arg0, %arg2 : i32, i32
  }
  func.func @transform_1(%arg0: i32, %arg1: i32, %arg2: i32) -> (i32, i32) {
    %c0_i32 = arith.constant 0 : i32
    return %arg2, %arg1 : i32, i32
  }
  func.func @transform_2(%arg0: i32, %arg1: i32, %arg2: i32) -> (i32, i32) {
    %c0_i32 = arith.constant 0 : i32
    %c0_i32_0 = arith.constant 0 : i32
    return %arg0, %c0_i32 : i32, i32
  }
  func.func @transform_3(%arg0: i32, %arg1: i32, %arg2: i32) -> (i32, i32) {
    %c0_i32 = arith.constant 0 : i32
    return %arg0, %arg1 : i32, i32
  }
  func.func @transform_4(%arg0: i32, %arg1: i32, %arg2: i32) -> (i32, i32) {
    %c0_i32 = arith.constant 0 : i32
    return %arg0, %arg1 : i32, i32
  }
}

module attributes {stable_mosaic.version = 11 : i64} {
  func.func @_mean_agg_kernel(%arg0: i32, %arg1: i32, %arg2: i32, %arg3: memref<16x128xbf16, #tpu.memory_space<vmem>>, %arg4: memref<128x128xbf16, #tpu.memory_space<vmem>>, %arg5: memref<16x1xf32, #tpu.memory_space<vmem>>, %arg6: memref<16x128xf32, #tpu.memory_space<vmem>>, %arg7: memref<16x128xf32, #tpu.memory_space<vmem>>) attributes {dimension_semantics = [#tpu.dimension_semantics<parallel>, #tpu.dimension_semantics<parallel>, #tpu.dimension_semantics<arbitrary>], iteration_bounds = array<i64: 1, 1, 1>, scalar_prefetch = 0 : i64, scratch_operands = 1 : i64, tpu.core_type = #tpu.core_type<tc>, window_params = [{transform_indices = @transform_0, window_bounds = array<i64: 16, 128>}, {transform_indices = @transform_1, window_bounds = array<i64: 128, 128>}, {transform_indices = @transform_2, window_bounds = array<i64: 16, 1>}, {transform_indices = @transform_3, window_bounds = array<i64: 16, 128>}]} {
    %c0_i32 = arith.constant 0 : i32
    %0 = arith.cmpi eq, %arg2, %c0_i32 : i32
    %1 = arith.extui %0 : i1 to i32
    %c0_i32_0 = arith.constant 0 : i32
    %2 = arith.cmpi ne, %1, %c0_i32_0 : i32
    scf.if %2 {
      %cst_10 = arith.constant 0.000000e+00 : f32
      %12 = vector.broadcast %cst_10 : f32 to vector<16x128xf32>
      %c0_11 = arith.constant 0 : index
      %c0_12 = arith.constant 0 : index
      %13 = vector.load %arg7[%c0_11, %c0_12] : memref<16x128xf32, #tpu.memory_space<vmem>>, vector<16x128xf32>
      tpu.vector_store %arg7[%c0_11, %c0_12], %12 {strides = array<i32>} : memref<16x128xf32, #tpu.memory_space<vmem>>, vector<16x128xf32>,
    } else {
    }
    %c0 = arith.constant 0 : index
    %c0_1 = arith.constant 0 : index
    %3 = vector.load %arg7[%c0, %c0_1] : memref<16x128xf32, #tpu.memory_space<vmem>>, vector<16x128xf32>
    %c0_2 = arith.constant 0 : index
    %c0_3 = arith.constant 0 : index
    %4 = vector.load %arg3[%c0_2, %c0_3] : memref<16x128xbf16, #tpu.memory_space<vmem>>, vector<16x128xbf16>
    %c0_4 = arith.constant 0 : index
    %c0_5 = arith.constant 0 : index
    %5 = vector.load %arg4[%c0_4, %c0_5] : memref<128x128xbf16, #tpu.memory_space<vmem>>, vector<128x128xbf16>
    %cst = arith.constant dense<0.000000e+00> : vector<16x128xf32>
    %6 = tpu.matmul %4, %5, %cst {dimension_numbers = #tpu.dot_dimension_numbers<[1], [0], [0], [1], [0, 0, 1, 1], [], []>} : vector<16x128xbf16>, vector<128x128xbf16>, vector<16x128xf32> -> vector<16x128xf32>
    %7 = arith.addf %3, %6 : vector<16x128xf32>
    %c0_6 = arith.constant 0 : index
    %c0_7 = arith.constant 0 : index
    %8 = vector.load %arg7[%c0_6, %c0_7] : memref<16x128xf32, #tpu.memory_space<vmem>>, vector<16x128xf32>
    tpu.vector_store %arg7[%c0_6, %c0_7], %7 {strides = array<i32>} : memref<16x128xf32, #tpu.memory_space<vmem>>, vector<16x128xf32>,
    %c0_i32_8 = arith.constant 0 : i32
    %9 = arith.cmpi eq, %arg2, %c0_i32_8 : i32
    %10 = arith.extui %9 : i1 to i32
    %c0_i32_9 = arith.constant 0 : i32
    %11 = arith.cmpi ne, %10, %c0_i32_9 : i32
    scf.if %11 {
      %c0_10 = arith.constant 0 : index
      %c0_11 = arith.constant 0 : index
      %12 = vector.load %arg7[%c0_10, %c0_11] : memref<16x128xf32, #tpu.memory_space<vmem>>, vector<16x128xf32>
      %c0_12 = arith.constant 0 : index
      %c0_13 = arith.constant 0 : index
      %13 = vector.load %arg5[%c0_12, %c0_13] : memref<16x1xf32, #tpu.memory_space<vmem>>, vector<16x1xf32>
      %14 = vector.broadcast %13 : vector<16x1xf32> to vector<16x128xf32>
      %15 = arith.mulf %12, %14 : vector<16x128xf32>
      %c0_14 = arith.constant 0 : index
      %c0_15 = arith.constant 0 : index
      %16 = vector.load %arg6[%c0_14, %c0_15] : memref<16x128xf32, #tpu.memory_space<vmem>>, vector<16x128xf32>
      tpu.vector_store %arg6[%c0_14, %c0_15], %15 {strides = array<i32>} : memref<16x128xf32, #tpu.memory_space<vmem>>, vector<16x128xf32>,
    } else {
    }
    return
  }
  func.func @transform_0(%arg0: i32, %arg1: i32, %arg2: i32) -> (i32, i32) {
    %c0_i32 = arith.constant 0 : i32
    return %arg0, %arg2 : i32, i32
  }
  func.func @transform_1(%arg0: i32, %arg1: i32, %arg2: i32) -> (i32, i32) {
    %c0_i32 = arith.constant 0 : i32
    return %arg2, %arg1 : i32, i32
  }
  func.func @transform_2(%arg0: i32, %arg1: i32, %arg2: i32) -> (i32, i32) {
    %c0_i32 = arith.constant 0 : i32
    %c0_i32_0 = arith.constant 0 : i32
    return %arg0, %c0_i32 : i32, i32
  }
  func.func @transform_3(%arg0: i32, %arg1: i32, %arg2: i32) -> (i32, i32) {
    %c0_i32 = arith.constant 0 : i32
    return %arg0, %arg1 : i32, i32
  }
}

module attributes {stable_mosaic.version = 11 : i64} {
  func.func @_mean_agg_kernel(%arg0: i32, %arg1: i32, %arg2: i32, %arg3: memref<8x128xbf16, #tpu.memory_space<vmem>>, %arg4: memref<128x128xbf16, #tpu.memory_space<vmem>>, %arg5: memref<8x1xf32, #tpu.memory_space<vmem>>, %arg6: memref<8x128xf32, #tpu.memory_space<vmem>>, %arg7: memref<8x128xf32, #tpu.memory_space<vmem>>) attributes {dimension_semantics = [#tpu.dimension_semantics<parallel>, #tpu.dimension_semantics<parallel>, #tpu.dimension_semantics<arbitrary>], iteration_bounds = array<i64: 1, 1, 1>, scalar_prefetch = 0 : i64, scratch_operands = 1 : i64, tpu.core_type = #tpu.core_type<tc>, window_params = [{transform_indices = @transform_0, window_bounds = array<i64: 8, 128>}, {transform_indices = @transform_1, window_bounds = array<i64: 128, 128>}, {transform_indices = @transform_2, window_bounds = array<i64: 8, 1>}, {transform_indices = @transform_3, window_bounds = array<i64: 8, 128>}]} {
    %c0_i32 = arith.constant 0 : i32
    %0 = arith.cmpi eq, %arg2, %c0_i32 : i32
    %1 = arith.extui %0 : i1 to i32
    %c0_i32_0 = arith.constant 0 : i32
    %2 = arith.cmpi ne, %1, %c0_i32_0 : i32
    scf.if %2 {
      %cst_10 = arith.constant 0.000000e+00 : f32
      %12 = vector.broadcast %cst_10 : f32 to vector<8x128xf32>
      %c0_11 = arith.constant 0 : index
      %c0_12 = arith.constant 0 : index
      %13 = vector.load %arg7[%c0_11, %c0_12] : memref<8x128xf32, #tpu.memory_space<vmem>>, vector<8x128xf32>
      tpu.vector_store %arg7[%c0_11, %c0_12], %12 {strides = array<i32>} : memref<8x128xf32, #tpu.memory_space<vmem>>, vector<8x128xf32>,
    } else {
    }
    %c0 = arith.constant 0 : index
    %c0_1 = arith.constant 0 : index
    %3 = vector.load %arg7[%c0, %c0_1] : memref<8x128xf32, #tpu.memory_space<vmem>>, vector<8x128xf32>
    %c0_2 = arith.constant 0 : index
    %c0_3 = arith.constant 0 : index
    %4 = vector.load %arg3[%c0_2, %c0_3] : memref<8x128xbf16, #tpu.memory_space<vmem>>, vector<8x128xbf16>
    %c0_4 = arith.constant 0 : index
    %c0_5 = arith.constant 0 : index
    %5 = vector.load %arg4[%c0_4, %c0_5] : memref<128x128xbf16, #tpu.memory_space<vmem>>, vector<128x128xbf16>
    %cst = arith.constant dense<0.000000e+00> : vector<8x128xf32>
    %6 = tpu.matmul %4, %5, %cst {dimension_numbers = #tpu.dot_dimension_numbers<[1], [0], [0], [1], [0, 0, 1, 1], [], []>} : vector<8x128xbf16>, vector<128x128xbf16>, vector<8x128xf32> -> vector<8x128xf32>
    %7 = arith.addf %3, %6 : vector<8x128xf32>
    %c0_6 = arith.constant 0 : index
    %c0_7 = arith.constant 0 : index
    %8 = vector.load %arg7[%c0_6, %c0_7] : memref<8x128xf32, #tpu.memory_space<vmem>>, vector<8x128xf32>
    tpu.vector_store %arg7[%c0_6, %c0_7], %7 {strides = array<i32>} : memref<8x128xf32, #tpu.memory_space<vmem>>, vector<8x128xf32>,
    %c0_i32_8 = arith.constant 0 : i32
    %9 = arith.cmpi eq, %arg2, %c0_i32_8 : i32
    %10 = arith.extui %9 : i1 to i32
    %c0_i32_9 = arith.constant 0 : i32
    %11 = arith.cmpi ne, %10, %c0_i32_9 : i32
    scf.if %11 {
      %c0_10 = arith.constant 0 : index
      %c0_11 = arith.constant 0 : index
      %12 = vector.load %arg7[%c0_10, %c0_11] : memref<8x128xf32, #tpu.memory_space<vmem>>, vector<8x128xf32>
      %c0_12 = arith.constant 0 : index
      %c0_13 = arith.constant 0 : index
      %13 = vector.load %arg5[%c0_12, %c0_13] : memref<8x1xf32, #tpu.memory_space<vmem>>, vector<8x1xf32>
      %14 = vector.broadcast %13 : vector<8x1xf32> to vector<8x128xf32>
      %15 = arith.mulf %12, %14 : vector<8x128xf32>
      %c0_14 = arith.constant 0 : index
      %c0_15 = arith.constant 0 : index
      %16 = vector.load %arg6[%c0_14, %c0_15] : memref<8x128xf32, #tpu.memory_space<vmem>>, vector<8x128xf32>
      tpu.vector_store %arg6[%c0_14, %c0_15], %15 {strides = array<i32>} : memref<8x128xf32, #tpu.memory_space<vmem>>, vector<8x128xf32>,
    } else {
    }
    return
  }
  func.func @transform_0(%arg0: i32, %arg1: i32, %arg2: i32) -> (i32, i32) {
    %c0_i32 = arith.constant 0 : i32
    return %arg0, %arg2 : i32, i32
  }
  func.func @transform_1(%arg0: i32, %arg1: i32, %arg2: i32) -> (i32, i32) {
    %c0_i32 = arith.constant 0 : i32
    return %arg2, %arg1 : i32, i32
  }
  func.func @transform_2(%arg0: i32, %arg1: i32, %arg2: i32) -> (i32, i32) {
    %c0_i32 = arith.constant 0 : i32
    %c0_i32_0 = arith.constant 0 : i32
    return %arg0, %c0_i32 : i32, i32
  }
  func.func @transform_3(%arg0: i32, %arg1: i32, %arg2: i32) -> (i32, i32) {
    %c0_i32 = arith.constant 0 : i32
    return %arg0, %arg1 : i32, i32
  }
}

</mosaic_0001>

<bundles_post_ra>
// kernel: multi_graph_layer_forward.4
= control target key start
LH: loop header
LB: loop body
LE: loop exit
PB: predicated region body
PF: predicated region fallthrough
CT: control target
= control target key end

     0   :  { %v184_v2 = vmov 0   ;;  %s244_s1 = inlined_call_operand.vmem [shape: bf16[128,128], index: 1, kind: input, shape index: {}]   ;;  %s245_s2 = inlined_call_operand.vmem [shape: f32[16,1], index: 2, kind: input, shape index: {}]   ;;  %s246_s0 = inlined_call_operand.vmem [shape: bf16[16,128], index: 0, kind: input, shape index: {}]   ;;  %s247_s3 = inlined_call_operand.vmem [shape: f32[16,128], index: 3, kind: output, shape index: {}]  }
   0x1   :  { %v181_v0 = vld [vmem:[%s244_s1 + $0x38] sm:$0xff]  ;;  %v180_v1 = vld [vmem:[%s244_s1 + $0x30] sm:$0xff]  ;;  %183 = vset.pattern.permute.xlu0 %v184_v2  ;;  %v117_v3 = vld [vmem:[%s245_s2] sm:$0xff] }
   0x2   :  { %94 = vmatpush.bf16.msra.mxu0 %v181_v0  ;;  %121 = vperm.xlu0 %183, %v117_v3   ;;  %v179_v4 = vld [vmem:[%s244_s1 + $0x28] sm:$0xff]  ;;  %v178_v6 = vld [vmem:[%s244_s1 + $0x20] sm:$0xff]  ;;  %v177_v7 = vld [vmem:[%s244_s1 + $0x18] sm:$0xff] }
   0x3   :  { %v118_v5 = vld [vmem:[%s245_s2 + $0x8] sm:$0xff]  ;;  %v176_v8 = vld [vmem:[%s244_s1 + $0x10] sm:$0xff]  ;;  %v174_v10 = vld [vmem:[%s244_s1] sm:$0xff] }
   0x4   :  { %v175_v9 = vld [vmem:[%s244_s1 + $0x8] sm:$0xff]  ;;  %v173_v11 = vld [vmem:[%s246_s0] sm:$0xff] }
   0x6   :  { %95 = vmatpush.bf16.msra.mxu0 %v180_v1 }
   0xa   :  { %96 = vmatpush.bf16.msra.mxu0 %v179_v4  ;;  %126 = vperm.xlu0 %183, %v118_v5  }
   0xe   :  { %97 = vmatpush.bf16.msra.mxu0 %v178_v6 }
  0x12   :  { %98 = vmatpush.bf16.msra.mxu0 %v177_v7 }
  0x16   :  { %99 = vmatpush.bf16.msra.mxu0 %v176_v8 }
  0x1a   :  { %100 = vmatpush.bf16.msra.mxu0 %v175_v9 }
  0x1e   :  { %101 = vmatpush.bf16.msra.mxu0 %v174_v10 }
  0x21   :  { %102 = vmatmul.bf16.vlgmr.msra.gmra.mxu0 %v173_v11 }
  0x74   :  { %v122_v12 = vpop.permute.xlu0 %121 }
  0x7c   :  { %v127_v15 = vpop.permute.xlu0 %126 }
  0x9e   :  { %v103_v13 = vpop.f32.mrf.mxu0 }
  0x9f   :  { %v129_v14 = vmul.f32 %v122_v12, %v103_v13 }
  0xa1   :  { %131 = vst [vmem:[%s247_s3] sm:$0xff] %v129_v14 }
  0xa6   :  { %v105_v16 = vpop.f32.mrf.mxu0 }
  0xa7   :  { %v130_v17 = vmul.f32 %v127_v15, %v105_v16 }
  0xa9   :  { %132 = vst [vmem:[%s247_s3 + $0x8] sm:$0xff] %v130_v17 }

// kernel: multi_graph_layer_forward.5
= control target key start
LH: loop header
LB: loop body
LE: loop exit
PB: predicated region body
PF: predicated region fallthrough
CT: control target
= control target key end

     0   :  { %v191_v2 = vmov 0   ;;  %s262_s1 = inlined_call_operand.vmem [shape: bf16[128,128], index: 1, kind: input, shape index: {}]   ;;  %s263_s2 = inlined_call_operand.vmem [shape: f32[16,1], index: 2, kind: input, shape index: {}]   ;;  %s264_s0 = inlined_call_operand.vmem [shape: bf16[16,128], index: 0, kind: input, shape index: {}]   ;;  %s265_s3 = inlined_call_operand.vmem [shape: f32[16,128], index: 3, kind: input, shape index: {}, may-alias: {3,4}]   ;;  %s266_s4 = inlined_call_operand.vmem [shape: f32[16,128], index: 4, kind: output, shape index: {}, may-alias: {3,4}]  }
   0x1   :  { %v188_v0 = vld [vmem:[%s262_s1 + $0x38] sm:$0xff]  ;;  %v187_v1 = vld [vmem:[%s262_s1 + $0x30] sm:$0xff]  ;;  %190 = vset.pattern.permute.xlu0 %v191_v2  ;;  %v122_v3 = vld [vmem:[%s263_s2] sm:$0xff] }
   0x2   :  { %97 = vmatpush.bf16.msra.mxu0 %v188_v0  ;;  %126 = vperm.xlu0 %190, %v122_v3   ;;  %v186_v4 = vld [vmem:[%s262_s1 + $0x28] sm:$0xff]  ;;  %v185_v6 = vld [vmem:[%s262_s1 + $0x20] sm:$0xff]  ;;  %v184_v7 = vld [vmem:[%s262_s1 + $0x18] sm:$0xff] }
   0x3   :  { %v123_v5 = vld [vmem:[%s263_s2 + $0x8] sm:$0xff]  ;;  %v183_v8 = vld [vmem:[%s262_s1 + $0x10] sm:$0xff]  ;;  %v181_v10 = vld [vmem:[%s262_s1] sm:$0xff] }
   0x4   :  { %v182_v9 = vld [vmem:[%s262_s1 + $0x8] sm:$0xff]  ;;  %v180_v11 = vld [vmem:[%s264_s0] sm:$0xff] }
   0x5   :  { %v118_v14 = vld [vmem:[%s265_s3] sm:$0xff] }
   0x6   :  { %98 = vmatpush.bf16.msra.mxu0 %v187_v1 }
   0xa   :  { %99 = vmatpush.bf16.msra.mxu0 %v186_v4  ;;  %131 = vperm.xlu0 %190, %v123_v5  }
   0xe   :  { %100 = vmatpush.bf16.msra.mxu0 %v185_v6 }
  0x12   :  { %101 = vmatpush.bf16.msra.mxu0 %v184_v7 }
  0x16   :  { %102 = vmatpush.bf16.msra.mxu0 %v183_v8 }
  0x1a   :  { %103 = vmatpush.bf16.msra.mxu0 %v182_v9 }
  0x1e   :  { %104 = vmatpush.bf16.msra.mxu0 %v181_v10 }
  0x21   :  { %105 = vmatmul.bf16.vlgmr.msra.gmra.mxu0 %v180_v11 }
  0x74   :  { %v127_v12 = vpop.permute.xlu0 %126 }
  0x7c   :  { %v132_v17 = vpop.permute.xlu0 %131 }
  0x9e   :  { %v106_v13 = vpop.f32.mrf.mxu0 }
  0x9f   :  { %v134_v15 = vmul.f32 %v127_v12, %v106_v13 }
  0xa1   :  { %v136_v16 = vadd.f32 %v134_v15, %v118_v14 }
  0xa3   :  { %138 = vst [vmem:[%s266_s4] sm:$0xff] %v136_v16 }
  0xa6   :  { %v108_v18 = vpop.f32.mrf.mxu0 }
  0xa7   :  { %v135_v20 = vmul.f32 %v132_v17, %v108_v18 }
  0xaa   :  { %v119_v19 = vld [vmem:[%s265_s3 + $0x8] sm:$0xff] }
  0xab   :  { %v137_v21 = vadd.f32 %v135_v20, %v119_v19 }
  0xad   :  { %139 = vst [vmem:[%s266_s4 + $0x8] sm:$0xff] %v137_v21 }

// kernel: multi_graph_layer_forward.3
= control target key start
LH: loop header
LB: loop body
LE: loop exit
PB: predicated region body
PF: predicated region fallthrough
CT: control target
= control target key end

     0   :  { %v198_v2 = vmov 0   ;;  %s253_s0 = inlined_call_operand.vmem [shape: bf16[8,128], index: 0, kind: input, shape index: {}]   ;;  %s254_s1 = inlined_call_operand.vmem [shape: bf16[128,128], index: 1, kind: input, shape index: {}]   ;;  %s255_s2 = inlined_call_operand.vmem [shape: f32[8,1], index: 2, kind: input, shape index: {}]   ;;  %s256_s3 = inlined_call_operand.hbm [shape: f32[8,128], index: 3, kind: output, shape index: {}]  }
   0x1   :  { %v168_v0 = vld [vmem:[%s254_s1 + $0x38] sm:$0xff]  ;;  %v167_v1 = vld [vmem:[%s254_s1 + $0x30] sm:$0xff]  ;;  %171 = vset.pattern.permute.xlu0 %v198_v2  ;;  %v105_v3 = vld [vmem:[%s255_s2] sm:$0xff] }
   0x2   :  { %86 = vmatpush.bf16.msra.mxu0 %v168_v0 }
   0x3   :  { %8 = vsyncpa [#allocation4], 0  ;;  %108 = vperm.xlu0 %171, %v105_v3   ;;  %v166_v4 = vld [vmem:[%s254_s1 + $0x28] sm:$0xff]  ;;  %v165_v5 = vld [vmem:[%s254_s1 + $0x20] sm:$0xff]  ;;  %s199_s4 = smov [#allocation3]   ;;  %s120_s8 = sshll.u32 %s256_s3, 4  ;;  %s121_s8 = int_to_ptr.hbm [resolvable:$true] %s120_s8 }
   0x4   :  { %v164_v6 = vld [vmem:[%s254_s1 + $0x18] sm:$0xff]  ;;  %v163_v7 = vld [vmem:[%s254_s1 + $0x10] sm:$0xff]  ;;  %v162_v8 = vld [vmem:[%s254_s1 + $0x8] sm:$0xff]  ;;  %s118_s5 = sshll.u32 %s199_s4, 4  ;;  %s119_s5 = int_to_ptr.vmem [resolvable:$true] %s118_s5 }
   0x5   :  { %v161_v9 = vld [vmem:[%s254_s1] sm:$0xff] }
   0x6   :  { %87 = vmatpush.bf16.msra.mxu0 %v167_v1  ;;  %v21_v10 = vld [vmem:[%s253_s0] sm:$0xf] }
   0xa   :  { %88 = vmatpush.bf16.msra.mxu0 %v166_v4 }
   0xe   :  { %89 = vmatpush.bf16.msra.mxu0 %v165_v5 }
  0x12   :  { %90 = vmatpush.bf16.msra.mxu0 %v164_v6 }
  0x16   :  { %91 = vmatpush.bf16.msra.mxu0 %v163_v7 }
  0x1a   :  { %92 = vmatpush.bf16.msra.mxu0 %v162_v8 }
  0x1e   :  { %93 = vmatpush.bf16.msra.mxu0 %v161_v9 }
  0x21   :  { %94 = vmatmul.bf16.vlgmr.msra.gmra.mxu0 %v21_v10 }
  0x75   :  { %v109_v11 = vpop.permute.xlu0 %108 }
  0x9e   :  { %v95_v12 = vpop.f32.mrf.mxu0 }
  0x9f   :  { %v111_v13 = vmul.f32 %v109_v11, %v95_v12 }
  0xa1   :  { %112 = vst [vmem:[#allocation3] sm:$0xff] %v111_v13 }
  0xa2   :  { %123 = dma.vmem_to_hbm [thread:$0]  %s119_s5, 128, %s121_s8, [#allocation4]  }
  0xa6   :  { %v97_v14 = vpop.f32.mrf.mxu0 }
  0xa7   :  { %196 = dma.done.wait [#allocation4], 128  }
  0xa8   :  { %197 = vsyncadd [#allocation4], 4294967168 }
  0xa9   :  { %128 = vsyncpa [#allocation4], 1 }

</bundles_post_ra>
